<compile_context>
chip_gen: v7x
topology: tpu7x:2x2x1
jax: 0.10.0
libtpu: 0.0.40
codegen_flags: <defaults>
</compile_context>

<pallas_src>
import functools

import jax
import jax.numpy as jnp
from jax.experimental import pallas as pl
from jax.experimental.pallas import tpu as pltpu


def _round_up(x, m):
    return ((x + m - 1) // m) * m


def _choose_tb(B, tb):
    """16-sublane aligned batch tile; >=2 grid steps once B is large enough."""
    sub = 16  # bf16 packs 16 rows per vreg
    tb = max(sub, min(tb, _round_up(B, sub)))
    tb = _round_up(tb, sub)
    if B >= 2 * sub:
        # v7x megacore: dimension_semantics=("parallel",) only helps with >=2 steps.
        tb = min(tb, _round_up(pl.cdiv(B, 2), sub))
    return tb


def prepare_params(w1, b1, w2, b2, *, use_bf16=True, lane=128):
    """One-time (init-time) parameter prep.

    Casts the matmul weights to the MXU dtype and lane-pads fc2:
      w2 -> (H, Ap) zero-padded; b2 -> (1, Ap) padded with -1e30 so the padded
      logit columns exp() to 0 and never touch the softmax denominator.
    Biases stay f32 so all elementwise math is f32 (v5e-safe).
    """
    mxu_dtype = jnp.bfloat16 if use_bf16 else w1.dtype
    _, A = w2.shape
    Ap = _round_up(A, lane)
    w2p = jnp.pad(w2, ((0, 0), (0, Ap - A)))  # zero fill -> padded logits = bias
    b2p = jnp.pad(b2, ((0, 0), (0, Ap - A)), constant_values=-1e30)
    return (w1.astype(mxu_dtype),
            b1.astype(jnp.float32),
            w2p.astype(mxu_dtype),
            b2p.astype(jnp.float32))


def policy_kernel(x_ref, w1_ref, b1_ref, w2_ref, b2_ref, o_ref, *,
                  action_dim, pad_out):
    # Cast the x tile to the MXU operand dtype in VMEM (no wrapper HBM pass).
    x = x_ref[...].astype(w1_ref.dtype)
    # fc1: MXU matmul, f32 accumulate; bias + ReLU in f32.
    h = jnp.dot(x, w1_ref[...], preferred_element_type=jnp.float32)
    h = jnp.maximum(h + b1_ref[...], 0.0)
    # fc2 on the lane-padded (H, Ap) weights; padded bias cols are -1e30.
    logits = jnp.dot(h.astype(w2_ref.dtype), w2_ref[...],
                     preferred_element_type=jnp.float32)
    logits = logits + b2_ref[...]
    # softmax over the action axis (torch dim=1 for 2-D input), all f32.
    m = jnp.max(logits, axis=-1, keepdims=True)
    e = jnp.exp(logits - m)               # padded lanes: exp(-1e30 - m) == 0
    denom = jnp.sum(e, axis=-1, keepdims=True)
    # EUP approx reciprocal + one f32 Newton step (VPU) -> near-exact 1/denom.
    r = pl.reciprocal(denom, approx=True)
    r = r * (2.0 - denom * r)
    probs = e * r
    if pad_out:
        o_ref[...] = probs.astype(o_ref.dtype)                 # lane-dense store
    else:
        o_ref[...] = probs[:, :action_dim].astype(o_ref.dtype)  # narrow store


@functools.partial(jax.jit, static_argnames=("action_dim", "tb"))
def policy_net_forward(x, w1, b1, w2p, b2p, *, action_dim, tb=1024):
    """x: (B, S) f32; w1: (S, H) bf16; b1: (1, H) f32; w2p: (H, Ap) bf16;
    b2p: (1, Ap) f32 (Ap = action_dim rounded up to 128). Returns (B, A) f32."""
    B, S = x.shape
    H = w1.shape[1]
    Ap = w2p.shape[1]
    A = action_dim

    tb = _choose_tb(B, tb)
    grid = (pl.cdiv(B, tb),)  # ragged last block: no wrapper-side pad of x

    # Lane-dense (tb, Ap) output while the 32x column inflation is cheap;
    # fall back to the narrow (tb, A) store for very large batches.
    pad_out = B <= 4096
    out_cols = Ap if pad_out else A

    kernel = functools.partial(policy_kernel, action_dim=A, pad_out=pad_out)

    cost = pl.CostEstimate(
        flops=2 * B * (S * H + H * Ap),
        transcendentals=B * Ap,
        bytes_accessed=(x.size * x.dtype.itemsize
                        + w1.size * w1.dtype.itemsize
                        + w2p.size * w2p.dtype.itemsize
                        + b1.size * b1.dtype.itemsize
                        + b2p.size * b2p.dtype.itemsize
                        + B * out_cols * 4),
    )

    out = pl.pallas_call(
        kernel,
        out_shape=jax.ShapeDtypeStruct((B, out_cols), jnp.float32),
        grid_spec=pltpu.PrefetchScalarGridSpec(
            num_scalar_prefetch=0,
            grid=grid,
            in_specs=[
                pl.BlockSpec((tb, S), lambda i: (i, 0)),    # x: tiled over batch
                pl.BlockSpec((S, H), lambda i: (0, 0)),     # w1: VMEM-resident
                pl.BlockSpec((1, H), lambda i: (0, 0)),     # b1: VMEM-resident
                pl.BlockSpec((H, Ap), lambda i: (0, 0)),    # w2 (padded): resident
                pl.BlockSpec((1, Ap), lambda i: (0, 0)),    # b2 (padded): resident
            ],
            out_specs=pl.BlockSpec((tb, out_cols), lambda i: (i, 0)),
        ),
        compiler_params=pltpu.CompilerParams(
            dimension_semantics=("parallel",)),  # v7x: shard batch over both TCs
        cost_estimate=cost,
    )(x, w1, b1, w2p, b2p)

    return out[:, :A] if pad_out else out


def init_linear_params(key, in_features, out_features):
    """PyTorch nn.Linear default init: U(-1/sqrt(fan_in), 1/sqrt(fan_in))."""
    kw, kb = jax.random.split(key)
    bound = 1.0 / jnp.sqrt(jnp.float32(in_features))
    # Stored already transposed: (in, out) so the kernel does x @ W + b.
    w = jax.random.uniform(kw, (in_features, out_features), jnp.float32,
                           minval=-bound, maxval=bound)
    b = jax.random.uniform(kb, (1, out_features), jnp.float32,
                           minval=-bound, maxval=bound)
    return w, b


if __name__ == "__main__":
    # Small, deterministic shapes: batch=8, state_dim=8, hidden=128, actions=4
    batch = 8
    state_dim = 8
    hidden_dim = 128
    action_dim = 4

    key = jax.random.PRNGKey(0)
    kx, k1, k2 = jax.random.split(key, 3)

    x = jax.random.normal(kx, (batch, state_dim), jnp.float32)
    w1, b1 = init_linear_params(k1, state_dim, hidden_dim)
    w2, b2 = init_linear_params(k2, hidden_dim, action_dim)

    # One-time parameter prep (bf16 casts + fc2 lane padding), outside the
    # per-call jit — in an RL rollout loop this is done once at init.
    w1_p, b1_p, w2_p, b2_p = prepare_params(w1, b1, w2, b2, use_bf16=True)
    w1_p, b1_p, w2_p, b2_p = jax.block_until_ready((w1_p, b1_p, w2_p, b2_p))

    out = policy_net_forward(x, w1_p, b1_p, w2_p, b2_p, action_dim=action_dim)
    out = jax.block_until_ready(out)

    # Sanity check against a plain-JAX f32 reference (kernel uses bf16 MXU
    # operands, so tolerance is loosened accordingly).
    h_ref = jnp.maximum(x @ w1 + b1, 0.0)
    logits_ref = h_ref @ w2 + b2
    ref = jax.nn.softmax(logits_ref, axis=1)

    assert out.shape == (batch, action_dim)
    assert jnp.allclose(out, ref, atol=2e-2, rtol=2e-2)
    assert jnp.allclose(jnp.sum(out, axis=1), 1.0, atol=1e-3)

    print("KERNEL_OK")
</pallas_src>

<mosaic_0001>
module attributes {stable_mosaic.version = 11 : i64} {
  func.func @policy_kernel(%arg0: i32, %arg1: memref<16x8xf32, #tpu.memory_space<vmem>>, %arg2: memref<8x128xbf16, #tpu.memory_space<vmem>>, %arg3: memref<1x128xf32, #tpu.memory_space<vmem>>, %arg4: memref<128x128xbf16, #tpu.memory_space<vmem>>, %arg5: memref<1x128xf32, #tpu.memory_space<vmem>>, %arg6: memref<16x128xf32, #tpu.memory_space<vmem>>) attributes {dimension_semantics = [#tpu.dimension_semantics<parallel>], iteration_bounds = array<i64: 1>, scalar_prefetch = 0 : i64, scratch_operands = 0 : i64, tpu.core_type = #tpu.core_type<tc>, window_params = [{transform_indices = @transform_0, window_bounds = array<i64: 16, 8>}, {pipeline_mode = #tpu.pipeline_mode<synchronous>, transform_indices = @transform_1, window_bounds = array<i64: 8, 128>}, {pipeline_mode = #tpu.pipeline_mode<synchronous>, transform_indices = @transform_2, window_bounds = array<i64: 1, 128>}, {pipeline_mode = #tpu.pipeline_mode<synchronous>, transform_indices = @transform_3, window_bounds = array<i64: 128, 128>}, {pipeline_mode = #tpu.pipeline_mode<synchronous>, transform_indices = @transform_4, window_bounds = array<i64: 1, 128>}, {transform_indices = @transform_5, window_bounds = array<i64: 16, 128>}]} {
    %c0 = arith.constant 0 : index
    %c0_0 = arith.constant 0 : index
    %0 = vector.load %arg1[%c0, %c0_0] : memref<16x8xf32, #tpu.memory_space<vmem>>, vector<16x8xf32>
    %1 = arith.truncf %0 : vector<16x8xf32> to vector<16x8xbf16>
    %c0_1 = arith.constant 0 : index
    %c0_2 = arith.constant 0 : index
    %2 = vector.load %arg2[%c0_1, %c0_2] : memref<8x128xbf16, #tpu.memory_space<vmem>>, vector<8x128xbf16>
    %cst = arith.constant dense<0.000000e+00> : vector<16x128xf32>
    %3 = tpu.matmul %1, %2, %cst {dimension_numbers = #tpu.dot_dimension_numbers<[1], [0], [0], [1], [0, 0, 1, 1], [], []>} : vector<16x8xbf16>, vector<8x128xbf16>, vector<16x128xf32> -> vector<16x128xf32>
    %c0_3 = arith.constant 0 : index
    %c0_4 = arith.constant 0 : index
    %4 = vector.load %arg3[%c0_3, %c0_4] : memref<1x128xf32, #tpu.memory_space<vmem>>, vector<1x128xf32>
    %5 = vector.broadcast %4 : vector<1x128xf32> to vector<16x128xf32>
    %6 = arith.addf %3, %5 : vector<16x128xf32>
    %cst_5 = arith.constant 0.000000e+00 : f32
    %7 = vector.broadcast %cst_5 : f32 to vector<16x128xf32>
    %8 = arith.maximumf %6, %7 : vector<16x128xf32>
    %9 = arith.truncf %8 : vector<16x128xf32> to vector<16x128xbf16>
    %c0_6 = arith.constant 0 : index
    %c0_7 = arith.constant 0 : index
    %10 = vector.load %arg4[%c0_6, %c0_7] : memref<128x128xbf16, #tpu.memory_space<vmem>>, vector<128x128xbf16>
    %cst_8 = arith.constant dense<0.000000e+00> : vector<16x128xf32>
    %11 = tpu.matmul %9, %10, %cst_8 {dimension_numbers = #tpu.dot_dimension_numbers<[1], [0], [0], [1], [0, 0, 1, 1], [], []>} : vector<16x128xbf16>, vector<128x128xbf16>, vector<16x128xf32> -> vector<16x128xf32>
    %c0_9 = arith.constant 0 : index
    %c0_10 = arith.constant 0 : index
    %12 = vector.load %arg5[%c0_9, %c0_10] : memref<1x128xf32, #tpu.memory_space<vmem>>, vector<1x128xf32>
    %13 = vector.broadcast %12 : vector<1x128xf32> to vector<16x128xf32>
    %14 = arith.addf %11, %13 : vector<16x128xf32>
    %cst_11 = arith.constant dense<0xFF800000> : vector<16xf32>
    %15 = vector.multi_reduction <maximumf>, %14, %cst_11 [1] : vector<16x128xf32> to vector<16xf32>
    %16 = vector.shape_cast %15 : vector<16xf32> to vector<16x1xf32>
    %17 = vector.broadcast %16 : vector<16x1xf32> to vector<16x128xf32>
    %18 = arith.subf %14, %17 : vector<16x128xf32>
    %19 = math.exp %18 : vector<16x128xf32>
    %cst_12 = arith.constant dense<0.000000e+00> : vector<16xf32>
    %20 = vector.multi_reduction <add>, %19, %cst_12 [1] : vector<16x128xf32> to vector<16xf32>
    %21 = vector.shape_cast %20 : vector<16xf32> to vector<16x1xf32>
    %22 = tpu.reciprocal %21 {approx = true} : vector<16x1xf32> -> vector<16x1xf32>
    %23 = arith.mulf %21, %22 : vector<16x1xf32>
    %cst_13 = arith.constant 2.000000e+00 : f32
    %24 = vector.broadcast %cst_13 : f32 to vector<16x1xf32>
    %25 = arith.subf %24, %23 : vector<16x1xf32>
    %26 = arith.mulf %22, %25 : vector<16x1xf32>
    %27 = vector.broadcast %26 : vector<16x1xf32> to vector<16x128xf32>
    %28 = arith.mulf %19, %27 : vector<16x128xf32>
    %c0_14 = arith.constant 0 : index
    %c0_15 = arith.constant 0 : index
    %29 = vector.load %arg6[%c0_14, %c0_15] : memref<16x128xf32, #tpu.memory_space<vmem>>, vector<16x128xf32>
    tpu.vector_store %arg6[%c0_14, %c0_15], %28 {strides = array<i32>} : memref<16x128xf32, #tpu.memory_space<vmem>>, vector<16x128xf32>,
    return
  }
  func.func @transform_0(%arg0: i32) -> (i32, i32) {
    %c0_i32 = arith.constant 0 : i32
    %c0_i32_0 = arith.constant 0 : i32
    return %arg0, %c0_i32 : i32, i32
  }
  func.func @transform_1(%arg0: i32) -> (i32, i32) {
    %c0_i32 = arith.constant 0 : i32
    %c0_i32_0 = arith.constant 0 : i32
    %c0_i32_1 = arith.constant 0 : i32
    return %c0_i32, %c0_i32_0 : i32, i32
  }
  func.func @transform_2(%arg0: i32) -> (i32, i32) {
    %c0_i32 = arith.constant 0 : i32
    %c0_i32_0 = arith.constant 0 : i32
    %c0_i32_1 = arith.constant 0 : i32
    return %c0_i32, %c0_i32_0 : i32, i32
  }
  func.func @transform_3(%arg0: i32) -> (i32, i32) {
    %c0_i32 = arith.constant 0 : i32
    %c0_i32_0 = arith.constant 0 : i32
    %c0_i32_1 = arith.constant 0 : i32
    return %c0_i32, %c0_i32_0 : i32, i32
  }
  func.func @transform_4(%arg0: i32) -> (i32, i32) {
    %c0_i32 = arith.constant 0 : i32
    %c0_i32_0 = arith.constant 0 : i32
    %c0_i32_1 = arith.constant 0 : i32
    return %c0_i32, %c0_i32_0 : i32, i32
  }
  func.func @transform_5(%arg0: i32) -> (i32, i32) {
    %c0_i32 = arith.constant 0 : i32
    %c0_i32_0 = arith.constant 0 : i32
    return %arg0, %c0_i32 : i32, i32
  }
}

</mosaic_0001>

<bundles_post_ra>
// kernel: policy_net_forward.1
= control target key start
LH: loop header
LB: loop body
LE: loop exit
PB: predicated region body
PF: predicated region fallthrough
CT: control target
= control target key end

     0   :  { %10 = vsyncpa [#allocation3], 0  ;;  %s534_s0 = inlined_call_operand.hbm [shape: f32[8,8], index: 0, kind: input, shape index: {}]   ;;  %s535_s1 = inlined_call_operand.hbm [shape: bf16[8,128], index: 1, kind: input, shape index: {}]   ;;  %s536_s2 = inlined_call_operand.vmem [shape: f32[1,128], index: 2, kind: input, shape index: {}]   ;;  %s537_s3 = inlined_call_operand.hbm [shape: bf16[128,128], index: 3, kind: input, shape index: {}]   ;;  %s538_s4 = inlined_call_operand.vmem [shape: f32[1,128], index: 4, kind: input, shape index: {}]   ;;  %s539_s5 = inlined_call_operand.vmem [shape: f32[8,128], index: 5, kind: output, shape index: {}]  }
   0x1   :  { %11 = vsyncpa [#allocation5], 0 }
   0x2   :  { %16 = vsyncadd [#allocation3], 128  ;;  %s442_s18 = smov [#allocation4]   ;;  %s443_s20 = smov [#allocation2]  }
   0x3   :  { %s30_s19 = sshll.u32 %s442_s18, 4  ;;  %s17_s21 = sshll.u32 %s443_s20, 4  ;;  %s31_s19 = int_to_ptr.vmem [resolvable:$true] %s30_s19  ;;  %s481_s21 = int_to_ptr.vmem [resolvable:$true] %s17_s21 }
   0x4   :  { %s372_s24 = scalar_lea.hbm %s535_s1, 64 }
   0x5   :  { %p373_p0 = scmp.ne.s32.totalorder %s535_s1, %s372_s24  ;;  %p376_p1 = scmp.lt.u32.totalorder %s372_s24, %s535_s1 }
   0x7   :  { %p378_p2 = pnand %p376_p1, %p373_p0 }
   0x9   :  { %381 = shalt.err (!%p378_p2)
}
   0xa   :  { %s382_s29 = scalar_lea.vmem %s31_s19, 64  ;;  %p387_p4 = scmp.lt.s32.totalorder %s31_s19, %s31_s19 }
   0xb   :  { %p383_p3 = scmp.ne.s32.totalorder %s31_s19, %s382_s29  ;;  %p388_p5 = scmp.lt.s32.totalorder %s382_s29, %s382_s29 }
   0xd   :  { %p389_p6 = por %p388_p5, %p387_p4 }
   0xf   :  { %p390_p7 = pnand %p389_p6, %p383_p3 }
  0x11   :  { %393 = shalt.err (!%p390_p7)
}
  0x12   :  { %33 = dma.hbm_to_vmem [thread:$0]  %s535_s1, 64, %s31_s19, [#allocation5]  }
  0x13   :  { %s394_s9 = scalar_lea.hbm %s534_s0, 128 }
  0x14   :  { %p395_p8 = scmp.ne.s32.totalorder %s534_s0, %s394_s9  ;;  %p398_p9 = scmp.lt.u32.totalorder %s394_s9, %s534_s0 }
  0x16   :  { %p400_p10 = pnand %p398_p9, %p395_p8 }
  0x18   :  { %403 = shalt.err (!%p400_p10)
}
  0x19   :  { %s404_s14 = scalar_lea.vmem %s481_s21, 128  ;;  %s408_s1 = scalar_lea.vmem %s481_s21, 256 }
  0x1a   :  { %p405_p11 = scmp.ne.s32.totalorder %s481_s21, %s404_s14  ;;  %p409_p12 = scmp.lt.s32.totalorder %s481_s21, %s481_s21 }
  0x1b   :  { %p410_p13 = scmp.lt.s32.totalorder %s408_s1, %s404_s14 }
  0x1d   :  { %p411_p0 = por %p410_p13, %p409_p12 }
  0x1f   :  { %p412_p1 = pnand %p411_p0, %p405_p11 }
  0x21   :  { %415 = shalt.err (!%p412_p1)
}
  0x22   :  { %s444_s15 = smov 128   ;;  %s445_s16 = smov 8  }
  0x23   :  { %23 = dma.hbm_to_vmem [thread:$0]  %s534_s0, 128, %s481_s21, [#allocation3], %s444_s15, %s444_s15, %s445_s16  }
  0x24   :  { %s446_s19 = smov [#allocation6]   ;;  %s416_s24 = scalar_lea.hbm %s537_s3, 1024 }
  0x25   :  { %s41_s20 = sshll.u32 %s446_s19, 4  ;;  %p417_p2 = scmp.ne.s32.totalorder %s537_s3, %s416_s24  ;;  %s42_s20 = int_to_ptr.vmem [resolvable:$true] %s41_s20 }
  0x26   :  { %p420_p3 = scmp.lt.u32.totalorder %s416_s24, %s537_s3 }
  0x28   :  { %p422_p4 = pnand %p420_p3, %p417_p2 }
  0x2a   :  { %425 = shalt.err (!%p422_p4)
}
  0x2b   :  { %s426_s29 = scalar_lea.vmem %s42_s20, 1024  ;;  %p431_p6 = scmp.lt.s32.totalorder %s42_s20, %s42_s20 }
  0x2c   :  { %p427_p5 = scmp.ne.s32.totalorder %s42_s20, %s426_s29  ;;  %p432_p7 = scmp.lt.s32.totalorder %s426_s29, %s426_s29 }
  0x2e   :  { %p433_p8 = por %p432_p7, %p431_p6 }
  0x30   :  { %p434_p9 = pnand %p433_p8, %p427_p5 }
  0x32   :  { %437 = shalt.err (!%p434_p9)
}
  0x33   :  { %s447_s0 = smov 64   ;;  %s448_s21 = smov 4  }
  0x34   :  { %47 = dma.hbm_to_vmem [thread:$0]  %s537_s3, 1024, %s42_s20, [#allocation5], %s447_s0, %s447_s0, %s448_s21  }
  0x35   :  { %438 = dma.done.wait [#allocation3], 256  }
  0x36   :  { %439 = vsyncadd [#allocation3], 4294967040 }
  0x37   :  { %440 = dma.done.wait [#allocation5], 1088  }
  0x38   :  { %441 = vsyncadd [#allocation5], 4294966208  ;;  %v449_v0 = vmov 0.0   ;;  %vm450_vm0 = vmmov 0   ;;  %vm75_vm1 = vcmask 1043456   ;;  %v60_v2 = vld [vmem:[#allocation2] sm:$0xff] }
  0x39   :  { %325 = vmatprep.subr.bf16.mxu0 %v449_v0  ;;  %327 = vmatprep.mubr.msk.bf16.mxu0 %vm450_vm0, %v449_v0  ;;  %v63_v1 = vld [vmem:[#allocation4] sm:$0xf]  ;;  %v61_v3 = vld [vmem:[#allocation2 + $0x8] sm:$0xff]  ;;  %v360_v6 = vld [vmem:[#allocation6] sm:$0xff]   ;;  %vm71_vm2 = vcmask 64512  }
  0x3a   :  { %331 = vmatprep.subr.bf16.mxu1 %v449_v0  ;;  %347 = vmatprep.mubr.msk.bf16.mxu1 %vm450_vm0, %v449_v0  ;;  %v77_v4 = vsel %vm75_vm1, %v63_v1, 0  ;;  %v62_v5 = vpack.c.bf16 %v61_v3, %v60_v2  ;;  %v361_v7 = vld [vmem:[#allocation6 + $0x8] sm:$0xff]   ;;  %v362_v8 = vld [vmem:[#allocation6 + $0x10] sm:$0xff]   ;;  %v363_v9 = vld [vmem:[#allocation6 + $0x18] sm:$0xff]  }
  0x3b   :  { %326 = vmatpush3.bf16.msra.mxu0 %v77_v4  ;;  %332 = vmatpush3.bf16.msra.mxu1 %v360_v6  ;;  %v364_v10 = vld [vmem:[#allocation6 + $0x20] sm:$0xff]   ;;  %v365_v11 = vld [vmem:[#allocation6 + $0x28] sm:$0xff]   ;;  %v366_v12 = vld [vmem:[#allocation6 + $0x30] sm:$0xff]  }
  0x3c   :  { %333 = vmatprep.subr.bf16.mxu1 %v449_v0  ;;  %v367_v13 = vld [vmem:[#allocation6 + $0x38] sm:$0xff]   ;;  %v303_v14 = vld [vmem:[%s536_s2] ss:$0 sm:$0xff] }
  0x3d   :  { %v305_v24 = vld [vmem:[%s538_s4] ss:$0 sm:$0xff] }
  0x3e   :  { %328 = vmatmul.mubr.msk.bf16.vlgmr.msra.gmra.mrb[0].mxu0 %vm71_vm2, %v62_v5 }
  0x3f   :  { %334 = vmatpush3.bf16.msra.mxu1 %v361_v7 }
  0x40   :  { %335 = vmatprep.subr.bf16.mxu1 %v449_v0 }
  0x43   :  { %336 = vmatpush3.bf16.msra.mxu1 %v362_v8 }
  0x44   :  { %337 = vmatprep.subr.bf16.mxu1 %v449_v0 }
  0x47   :  { %338 = vmatpush3.bf16.msra.mxu1 %v363_v9 }
  0x48   :  { %339 = vmatprep.subr.bf16.mxu1 %v449_v0 }
  0x4b   :  { %340 = vmatpush3.bf16.msra.mxu1 %v364_v10 }
  0x4c   :  { %341 = vmatprep.subr.bf16.mxu1 %v449_v0 }
  0x4f   :  { %342 = vmatpush3.bf16.msra.mxu1 %v365_v11 }
  0x50   :  { %343 = vmatprep.subr.bf16.mxu1 %v449_v0 }
  0x53   :  { %344 = vmatpush3.bf16.msra.mxu1 %v366_v12 }
  0x54   :  { %345 = vmatprep.subr.bf16.mxu1 %v449_v0 }
  0x57   :  { %346 = vmatpush3.bf16.msra.mxu1 %v367_v13 }
 0x111   :  { %v113_v15 = vpop.f32.mrb[0].mxu0 }
 0x112   :  { %v114_v16 = vadd.f32 %v303_v14, %v113_v15  ;;  %v329_v17 = vpop.f32.mrb[1].mxu0 }
 0x113   :  { %v116_v18 = vpop.f32.mrb[2].mxu0 }
 0x114   :  { %v117_v19 = vadd.f32 %v303_v14, %v116_v18  ;;  %v330_v20 = vpop.f32.mrb[3].mxu0  ;;  %v120_v21 = vmax.f32 %v114_v16, 0.0 }
 0x116   :  { %v121_v22 = vmax.f32 %v117_v19, 0.0 }
 0x118   :  { %v122_v23 = vpack.c.bf16 %v121_v22, %v120_v21 }
 0x11a   :  { %348 = vmatmul.mubr.bf16.vlgmr.msra.gmra.mrb[0].mxu1 %v122_v23 }
 0x1ed   :  { %v228_v25 = vpop.f32.mrb[0].mxu1 }
 0x1ee   :  { %v229_v26 = vadd.f32 %v305_v24, %v228_v25  ;;  %v349_v27 = vpop.f32.mrb[1].mxu1 }
 0x1ef   :  { %v231_v28 = vpop.f32.mrb[2].mxu1 }
 0x1f0   :  { %235 = vmax.xlane.f32.xlu0 %v229_v26  ;;  %v350_v29 = vpop.f32.mrb[3].mxu1 }
 0x27d   :  { %v236_v30 = vpop.xlane.xlu0 %235 }
 0x27e   :  { %v239_v31 = vsub.f32 %v229_v26, %v236_v30 }
 0x280   :  { %v241_v32 = vmul.f32 1.442695, %v239_v31 }
 0x282   :  { %368 = vpow2.f32 %v241_v32 }
 0x28c   :  { %v369_v33 = vpop.eup %368 }
 0x28d   :  { %245 = vadd.xlane.f32.xlu0 %v369_v33 }
 0x31a   :  { %v246_v34 = vpop.xlane.xlu0 %245 }
 0x31b   :  { %370 = vrcp.f32 %v246_v34 }
 0x325   :  { %v371_v35 = vpop.eup %370 }
 0x326   :  { %v251_v36 = vmul.f32 %v371_v35, %v246_v34 }
 0x328   :  { %v253_v37 = vsub.f32 2.0, %v251_v36 }
 0x32a   :  { %v255_v38 = vmul.f32 %v371_v35, %v253_v37 }
 0x32c   :  { %v257_v39 = vmul.f32 %v369_v33, %v255_v38 }
 0x32e   :  { %291 = vst [vmem:[%s539_s5] sm:$0xff] %v257_v39 }
 0x32f   :  { %297 = vsyncpa [#allocation3], 1 }
 0x330   :  { %298 = vsyncpa [#allocation5], 1 }

</bundles_post_ra>
